<compile_context>
chip_gen: v7x
topology: tpu7x:2x2x1
jax: 0.10.0
libtpu: 0.0.40
codegen_flags: <defaults>
</compile_context>

<pallas_src>
import functools

import jax
import jax.numpy as jnp
from jax import lax
from jax.experimental import pallas as pl
from jax.experimental.pallas import tpu as pltpu


def _round_up(x: int, m: int) -> int:
    return (x + m - 1) // m * m


# ----------------------------- Pallas kernel --------------------------------
def _basic_block_kernel(x_ref, w1_ref, w2_ref, s1_ref, b1_ref, s2_ref, b2_ref,
                        o_ref, *, true_len: int, tile_l: int):
    """One (batch, length-tile) block per grid step.

    x_ref : (1, 1, TL+4, Cp)  input window incl. 2-row halo each side (f32, NLC)
    w*_ref: (3*Cp, Cp)        stacked conv weights  W[k*Cp+ci, co]
    s*/b* : (1, Cp)           folded BN scale / shift (f32)
    o_ref : (1, TL, Cp)       output tile
    """
    TL = tile_l
    l = pl.program_id(1)                       # length-tile index
    cdt = w1_ref.dtype                         # MXU compute dtype (bf16 or f32)

    xw = x_ref[0, 0]                           # (TL+4, Cp) f32

    # ---- conv1 on window rows 1 .. TL+2 (orig positions l*TL-1 .. l*TL+TL) --
    # One MXU call: stack the three shifted views on the lane axis (K = 3*Cp).
    lhs1 = jnp.concatenate(
        [xw[0:TL + 2], xw[1:TL + 3], xw[2:TL + 4]], axis=1).astype(cdt)
    z1 = jnp.dot(lhs1, w1_ref[...], preferred_element_type=jnp.float32)

    # bn1 (folded) + ReLU, in f32
    h = jnp.maximum(z1 * s1_ref[...] + b1_ref[...], 0.0)        # (TL+2, Cp)

    # conv2's zero padding: rows of h that fall outside the real signal
    # ([0, true_len)) must be exactly zero.  Only hits the edge tiles.
    pos = l * TL + lax.broadcasted_iota(jnp.int32, h.shape, 0) - 1
    h = jnp.where((pos >= 0) & (pos < true_len), h, 0.0)

    # ---- conv2 on the TL real rows ----
    lhs2 = jnp.concatenate(
        [h[0:TL], h[1:TL + 1], h[2:TL + 2]], axis=1).astype(cdt)
    z2 = jnp.dot(lhs2, w2_ref[...], preferred_element_type=jnp.float32)

    # bn2 (folded) + residual + ReLU, all in f32
    x_id = xw[2:TL + 2]                        # identity rows of this tile
    out = jnp.maximum(z2 * s2_ref[...] + b2_ref[...] + x_id, 0.0)
    o_ref[0] = out.astype(o_ref.dtype)


# ------------------------------- wrapper -------------------------------------
def basic_block_pallas(x_ncl, w1, w2, bn1, bn2, *, eps=1e-5, tile_l=None,
                       compute_dtype=jnp.bfloat16):
    """x_ncl: (N, C, L) f32; w*: (C, C, 3) torch layout; bn*: dict of (C,)."""
    N, C, L = x_ncl.shape

    Cp = _round_up(max(C, 128), 128)           # lane-dense channel count
    if tile_l is None:
        tile_l = 512                           # cap VMEM regardless of L
    TL = min(_round_up(tile_l, 8), _round_up(L, 8))
    Lpad = _round_up(L, TL)
    nL = Lpad // TL
    TLH = TL + 4                               # 2-row halo per side (2 convs)

    # Fold BN (inference form) into per-channel scale / shift; padded channels
    # get scale=0, shift=0 so they stay exactly zero through the whole block.
    def fold(bn):
        scale = bn["gamma"] / jnp.sqrt(bn["var"] + eps)
        shift = bn["beta"] - bn["mean"] * scale
        scale = jnp.zeros((Cp,), jnp.float32).at[:C].set(scale)
        shift = jnp.zeros((Cp,), jnp.float32).at[:C].set(shift)
        return scale.reshape(1, Cp), shift.reshape(1, Cp)

    s1, b1 = fold(bn1)
    s2, b2 = fold(bn2)

    # Weights: torch (Co, Ci, 3) -> stacked (3*Cp, Cp) with W[k*Cp+ci, co],
    # matching the lane-stacked LHS.  Cast to the MXU compute dtype.
    def stack_w(w):
        wp = jnp.zeros((Cp, Cp, 3), jnp.float32).at[:C, :C, :].set(w)
        return jnp.transpose(wp, (2, 1, 0)).reshape(3 * Cp, Cp).astype(compute_dtype)

    w1s = stack_w(w1)
    w2s = stack_w(w2)

    # Layout + halo windows (single fused XLA copy pass):
    # NCL -> NLC, pad channels to Cp, pad length by 2 halo + round-up tail,
    # then gather overlapping (TL+4)-row windows -> (N, nL, TL+4, Cp).
    x_nlc = jnp.transpose(x_ncl, (0, 2, 1))
    x_nlc = jnp.pad(x_nlc, ((0, 0), (2, 2 + Lpad - L), (0, Cp - C)))
    win_idx = jnp.arange(nL)[:, None] * TL + jnp.arange(TLH)[None, :]
    x_win = x_nlc[:, win_idx, :]               # (N, nL, TLH, Cp)

    kernel = functools.partial(_basic_block_kernel, true_len=L, tile_l=TL)

    out_nlc = pl.pallas_call(
        kernel,
        out_shape=jax.ShapeDtypeStruct((N, Lpad, Cp), jnp.float32),
        grid_spec=pltpu.PrefetchScalarGridSpec(
            num_scalar_prefetch=0,
            grid=(N, nL),
            in_specs=[
                pl.BlockSpec((1, 1, TLH, Cp), lambda n, l: (n, l, 0, 0)),  # x windows
                pl.BlockSpec((3 * Cp, Cp), lambda n, l: (0, 0)),           # w1 (const)
                pl.BlockSpec((3 * Cp, Cp), lambda n, l: (0, 0)),           # w2 (const)
                pl.BlockSpec((1, Cp), lambda n, l: (0, 0)),                # bn1 scale
                pl.BlockSpec((1, Cp), lambda n, l: (0, 0)),                # bn1 shift
                pl.BlockSpec((1, Cp), lambda n, l: (0, 0)),                # bn2 scale
                pl.BlockSpec((1, Cp), lambda n, l: (0, 0)),                # bn2 shift
            ],
            out_specs=pl.BlockSpec((1, TL, Cp), lambda n, l: (n, l, 0)),
        ),
        compiler_params=pltpu.CompilerParams(
            dimension_semantics=("parallel", "parallel"),
            vmem_limit_bytes=48 * 1024 * 1024),
    )(x_win, w1s, w2s, s1, b1, s2, b2)

    # Strip length/channel padding, back to NCL.
    return jnp.transpose(out_nlc[:, :L, :C], (0, 2, 1))


# ---------------------------- pure-JAX reference ----------------------------
def _conv1d_ref(x_ncl, w):
    return lax.conv_general_dilated(
        x_ncl, w, window_strides=(1,), padding=((1, 1),),
        dimension_numbers=("NCH", "OIH", "NCH"),
        precision=lax.Precision.HIGHEST)


def basic_block_ref(x_ncl, w1, w2, bn1, bn2, *, eps=1e-5):
    def bn(h, p):
        sc = (p["gamma"] / jnp.sqrt(p["var"] + eps)).reshape(1, -1, 1)
        sh = (p["beta"] - p["mean"] * p["gamma"] / jnp.sqrt(p["var"] + eps)
              ).reshape(1, -1, 1)
        return h * sc + sh

    h = jnp.maximum(bn(_conv1d_ref(x_ncl, w1), bn1), 0.0)
    h = bn(_conv1d_ref(h, w2), bn2)
    return jnp.maximum(h + x_ncl, 0.0)


if __name__ == "__main__":
    # Small shapes consistent with the module: in_channels == out_channels,
    # stride=1, downsample=None (so the residual add is shape-valid).
    N, C, L = 2, 32, 40
    key = jax.random.PRNGKey(0)
    k_x, k_w1, k_w2, k_g1, k_b1, k_g2, k_b2, k_m1, k_m2 = jax.random.split(key, 9)

    x = jax.random.normal(k_x, (N, C, L), jnp.float32)
    w1 = jax.random.normal(k_w1, (C, C, 3), jnp.float32) * 0.1
    w2 = jax.random.normal(k_w2, (C, C, 3), jnp.float32) * 0.1

    bn1 = dict(gamma=1.0 + 0.1 * jax.random.normal(k_g1, (C,), jnp.float32),
               beta=0.1 * jax.random.normal(k_b1, (C,), jnp.float32),
               mean=0.1 * jax.random.normal(k_m1, (C,), jnp.float32),
               var=jnp.abs(1.0 + 0.1 * jax.random.normal(k_m2, (C,), jnp.float32)))
    bn2 = dict(gamma=1.0 + 0.1 * jax.random.normal(k_g2, (C,), jnp.float32),
               beta=0.1 * jax.random.normal(k_b2, (C,), jnp.float32),
               mean=jnp.zeros((C,), jnp.float32),
               var=jnp.ones((C,), jnp.float32))

    ref = basic_block_ref(x, w1, w2, bn1, bn2)

    # 1) f32 MXU path, multi-tile L (exercises halo + edge masking): tight check.
    out_f32 = jax.block_until_ready(basic_block_pallas(
        x, w1, w2, bn1, bn2, tile_l=16, compute_dtype=jnp.float32))
    assert out_f32.shape == (N, C, L)
    assert jnp.allclose(out_f32, ref, atol=1e-3, rtol=1e-3), "f32 mismatch vs ref"

    # 2) bf16 MXU path (v6e/v7x-friendly), multi-tile L: loose check vs f32 ref.
    out_bf16 = jax.block_until_ready(basic_block_pallas(
        x, w1, w2, bn1, bn2, tile_l=16, compute_dtype=jnp.bfloat16))
    assert jnp.allclose(out_bf16, ref, atol=1e-1, rtol=1e-1), "bf16 mismatch vs ref"

    # 3) Default tile size (single L-tile at this small L), bf16 path.
    out_def = jax.block_until_ready(basic_block_pallas(x, w1, w2, bn1, bn2))
    assert out_def.shape == (N, C, L)
    assert jnp.allclose(out_def, ref, atol=1e-1, rtol=1e-1), "default-tile mismatch"

    print("KERNEL_OK")
</pallas_src>

<mosaic_0001>
module attributes {stable_mosaic.version = 11 : i64} {
  func.func @_basic_block_kernel(%arg0: i32, %arg1: i32, %arg2: memref<1x1x20x128xf32, #tpu.memory_space<vmem>>, %arg3: memref<384x128xf32, #tpu.memory_space<vmem>>, %arg4: memref<384x128xf32, #tpu.memory_space<vmem>>, %arg5: memref<1x128xf32, #tpu.memory_space<vmem>>, %arg6: memref<1x128xf32, #tpu.memory_space<vmem>>, %arg7: memref<1x128xf32, #tpu.memory_space<vmem>>, %arg8: memref<1x128xf32, #tpu.memory_space<vmem>>, %arg9: memref<1x16x128xf32, #tpu.memory_space<vmem>>) attributes {dimension_semantics = [#tpu.dimension_semantics<parallel>, #tpu.dimension_semantics<parallel>], iteration_bounds = array<i64: 2, 3>, scalar_prefetch = 0 : i64, scratch_operands = 0 : i64, tpu.core_type = #tpu.core_type<tc>, window_params = [{transform_indices = @transform_0, window_bounds = array<i64: 1, 1, 20, 128>}, {pipeline_mode = #tpu.pipeline_mode<synchronous>, transform_indices = @transform_1, window_bounds = array<i64: 384, 128>}, {pipeline_mode = #tpu.pipeline_mode<synchronous>, transform_indices = @transform_2, window_bounds = array<i64: 384, 128>}, {pipeline_mode = #tpu.pipeline_mode<synchronous>, transform_indices = @transform_3, window_bounds = array<i64: 1, 128>}, {pipeline_mode = #tpu.pipeline_mode<synchronous>, transform_indices = @transform_4, window_bounds = array<i64: 1, 128>}, {pipeline_mode = #tpu.pipeline_mode<synchronous>, transform_indices = @transform_5, window_bounds = array<i64: 1, 128>}, {pipeline_mode = #tpu.pipeline_mode<synchronous>, transform_indices = @transform_6, window_bounds = array<i64: 1, 128>}, {transform_indices = @transform_7, window_bounds = array<i64: 1, 16, 128>}]} {
    %c0 = arith.constant 0 : index
    %c0_0 = arith.constant 0 : index
    %c0_1 = arith.constant 0 : index
    %c0_2 = arith.constant 0 : index
    %0 = vector.load %arg2[%c0, %c0_0, %c0_1, %c0_2] : memref<1x1x20x128xf32, #tpu.memory_space<vmem>>, vector<1x1x20x128xf32>
    %1 = vector.shape_cast %0 : vector<1x1x20x128xf32> to vector<20x128xf32>
    %2 = vector.extract_strided_slice %1 {offsets = [0, 0], sizes = [18, 128], strides = [1, 1]} : vector<20x128xf32> to vector<18x128xf32>
    %3 = vector.extract_strided_slice %1 {offsets = [1, 0], sizes = [18, 128], strides = [1, 1]} : vector<20x128xf32> to vector<18x128xf32>
    %4 = vector.extract_strided_slice %1 {offsets = [2, 0], sizes = [18, 128], strides = [1, 1]} : vector<20x128xf32> to vector<18x128xf32>
    %5 = tpu.concatenate %2, %3, %4 in 1 : vector<18x128xf32>, vector<18x128xf32>, vector<18x128xf32> -> vector<18x384xf32>
    %c0_3 = arith.constant 0 : index
    %c0_4 = arith.constant 0 : index
    %6 = vector.load %arg3[%c0_3, %c0_4] : memref<384x128xf32, #tpu.memory_space<vmem>>, vector<384x128xf32>
    %cst = arith.constant dense<0.000000e+00> : vector<18x128xf32>
    %7 = tpu.matmul %5, %6, %cst {dimension_numbers = #tpu.dot_dimension_numbers<[1], [0], [0], [1], [0, 0, 1, 1], [], []>} : vector<18x384xf32>, vector<384x128xf32>, vector<18x128xf32> -> vector<18x128xf32>
    %c0_5 = arith.constant 0 : index
    %c0_6 = arith.constant 0 : index
    %8 = vector.load %arg5[%c0_5, %c0_6] : memref<1x128xf32, #tpu.memory_space<vmem>>, vector<1x128xf32>
    %9 = vector.broadcast %8 : vector<1x128xf32> to vector<18x128xf32>
    %10 = arith.mulf %7, %9 : vector<18x128xf32>
    %c0_7 = arith.constant 0 : index
    %c0_8 = arith.constant 0 : index
    %11 = vector.load %arg6[%c0_7, %c0_8] : memref<1x128xf32, #tpu.memory_space<vmem>>, vector<1x128xf32>
    %12 = vector.broadcast %11 : vector<1x128xf32> to vector<18x128xf32>
    %13 = arith.addf %10, %12 : vector<18x128xf32>
    %cst_9 = arith.constant 0.000000e+00 : f32
    %14 = vector.broadcast %cst_9 : f32 to vector<18x128xf32>
    %15 = arith.maximumf %13, %14 : vector<18x128xf32>
    %c16_i32 = arith.constant 16 : i32
    %16 = arith.muli %arg1, %c16_i32 : i32
    %17 = tpu.iota {dimensions = array<i32: 0>} : vector<18x128xi32>
    %18 = vector.broadcast %16 : i32 to vector<18x128xi32>
    %19 = arith.addi %18, %17 : vector<18x128xi32>
    %c1_i32 = arith.constant 1 : i32
    %20 = vector.broadcast %c1_i32 : i32 to vector<18x128xi32>
    %21 = arith.subi %19, %20 : vector<18x128xi32>
    %c0_i32 = arith.constant 0 : i32
    %22 = vector.broadcast %c0_i32 : i32 to vector<18x128xi32>
    %23 = arith.cmpi sge, %21, %22 : vector<18x128xi32>
    %c40_i32 = arith.constant 40 : i32
    %24 = vector.broadcast %c40_i32 : i32 to vector<18x128xi32>
    %25 = arith.cmpi slt, %21, %24 : vector<18x128xi32>
    %26 = arith.andi %23, %25 : vector<18x128xi1>
    %cst_10 = arith.constant 0.000000e+00 : f32
    %27 = vector.broadcast %cst_10 : f32 to vector<18x128xf32>
    %28 = arith.select %26, %15, %27 : vector<18x128xi1>, vector<18x128xf32>
    %29 = vector.extract_strided_slice %28 {offsets = [0, 0], sizes = [16, 128], strides = [1, 1]} : vector<18x128xf32> to vector<16x128xf32>
    %30 = vector.extract_strided_slice %28 {offsets = [1, 0], sizes = [16, 128], strides = [1, 1]} : vector<18x128xf32> to vector<16x128xf32>
    %31 = vector.extract_strided_slice %28 {offsets = [2, 0], sizes = [16, 128], strides = [1, 1]} : vector<18x128xf32> to vector<16x128xf32>
    %32 = tpu.concatenate %29, %30, %31 in 1 : vector<16x128xf32>, vector<16x128xf32>, vector<16x128xf32> -> vector<16x384xf32>
    %c0_11 = arith.constant 0 : index
    %c0_12 = arith.constant 0 : index
    %33 = vector.load %arg4[%c0_11, %c0_12] : memref<384x128xf32, #tpu.memory_space<vmem>>, vector<384x128xf32>
    %cst_13 = arith.constant dense<0.000000e+00> : vector<16x128xf32>
    %34 = tpu.matmul %32, %33, %cst_13 {dimension_numbers = #tpu.dot_dimension_numbers<[1], [0], [0], [1], [0, 0, 1, 1], [], []>} : vector<16x384xf32>, vector<384x128xf32>, vector<16x128xf32> -> vector<16x128xf32>
    %35 = vector.extract_strided_slice %1 {offsets = [2, 0], sizes = [16, 128], strides = [1, 1]} : vector<20x128xf32> to vector<16x128xf32>
    %c0_14 = arith.constant 0 : index
    %c0_15 = arith.constant 0 : index
    %36 = vector.load %arg7[%c0_14, %c0_15] : memref<1x128xf32, #tpu.memory_space<vmem>>, vector<1x128xf32>
    %37 = vector.broadcast %36 : vector<1x128xf32> to vector<16x128xf32>
    %38 = arith.mulf %34, %37 : vector<16x128xf32>
    %c0_16 = arith.constant 0 : index
    %c0_17 = arith.constant 0 : index
    %39 = vector.load %arg8[%c0_16, %c0_17] : memref<1x128xf32, #tpu.memory_space<vmem>>, vector<1x128xf32>
    %40 = vector.broadcast %39 : vector<1x128xf32> to vector<16x128xf32>
    %41 = arith.addf %38, %40 : vector<16x128xf32>
    %42 = arith.addf %41, %35 : vector<16x128xf32>
    %cst_18 = arith.constant 0.000000e+00 : f32
    %43 = vector.broadcast %cst_18 : f32 to vector<16x128xf32>
    %44 = arith.maximumf %42, %43 : vector<16x128xf32>
    %c0_19 = arith.constant 0 : index
    %c0_20 = arith.constant 0 : index
    %c0_21 = arith.constant 0 : index
    %45 = vector.load %arg9[%c0_19, %c0_20, %c0_21] : memref<1x16x128xf32, #tpu.memory_space<vmem>>, vector<1x16x128xf32>
    %46 = vector.shape_cast %45 : vector<1x16x128xf32> to vector<16x128xf32>
    %47 = vector.shape_cast %44 : vector<16x128xf32> to vector<1x16x128xf32>
    tpu.vector_store %arg9[%c0_19, %c0_20, %c0_21], %47 {strides = array<i32>} : memref<1x16x128xf32, #tpu.memory_space<vmem>>, vector<1x16x128xf32>,
    return
  }
  func.func @transform_0(%arg0: i32, %arg1: i32) -> (i32, i32, i32, i32) {
    %c0_i32 = arith.constant 0 : i32
    %c0_i32_0 = arith.constant 0 : i32
    %c0_i32_1 = arith.constant 0 : i32
    return %arg0, %arg1, %c0_i32, %c0_i32_0 : i32, i32, i32, i32
  }
  func.func @transform_1(%arg0: i32, %arg1: i32) -> (i32, i32) {
    %c0_i32 = arith.constant 0 : i32
    %c0_i32_0 = arith.constant 0 : i32
    %c0_i32_1 = arith.constant 0 : i32
    return %c0_i32, %c0_i32_0 : i32, i32
  }
  func.func @transform_2(%arg0: i32, %arg1: i32) -> (i32, i32) {
    %c0_i32 = arith.constant 0 : i32
    %c0_i32_0 = arith.constant 0 : i32
    %c0_i32_1 = arith.constant 0 : i32
    return %c0_i32, %c0_i32_0 : i32, i32
  }
  func.func @transform_3(%arg0: i32, %arg1: i32) -> (i32, i32) {
    %c0_i32 = arith.constant 0 : i32
    %c0_i32_0 = arith.constant 0 : i32
    %c0_i32_1 = arith.constant 0 : i32
    return %c0_i32, %c0_i32_0 : i32, i32
  }
  func.func @transform_4(%arg0: i32, %arg1: i32) -> (i32, i32) {
    %c0_i32 = arith.constant 0 : i32
    %c0_i32_0 = arith.constant 0 : i32
    %c0_i32_1 = arith.constant 0 : i32
    return %c0_i32, %c0_i32_0 : i32, i32
  }
  func.func @transform_5(%arg0: i32, %arg1: i32) -> (i32, i32) {
    %c0_i32 = arith.constant 0 : i32
    %c0_i32_0 = arith.constant 0 : i32
    %c0_i32_1 = arith.constant 0 : i32
    return %c0_i32, %c0_i32_0 : i32, i32
  }
  func.func @transform_6(%arg0: i32, %arg1: i32) -> (i32, i32) {
    %c0_i32 = arith.constant 0 : i32
    %c0_i32_0 = arith.constant 0 : i32
    %c0_i32_1 = arith.constant 0 : i32
    return %c0_i32, %c0_i32_0 : i32, i32
  }
  func.func @transform_7(%arg0: i32, %arg1: i32) -> (i32, i32, i32) {
    %c0_i32 = arith.constant 0 : i32
    %c0_i32_0 = arith.constant 0 : i32
    return %arg0, %arg1, %c0_i32 : i32, i32, i32
  }
}

</mosaic_0001>

<bundles_post_ra>
// kernel: tpu_custom_call.1
= control target key start
LH: loop header
LB: loop body
LE: loop exit
PB: predicated region body
PF: predicated region fallthrough
CT: control target
= control target key end

     0   :  { %12 = vsyncpa [#allocation3], 0  ;;  %s1919_s0 = inlined_call_operand.vmem [shape: f32[2,3,20,128], index: 0, kind: input, shape index: {}]   ;;  %s1920_s1 = inlined_call_operand.hbm [shape: f32[384,128], index: 1, kind: input, shape index: {}]   ;;  %s1921_s2 = inlined_call_operand.hbm [shape: f32[384,128], index: 2, kind: input, shape index: {}]   ;;  %s1922_s3 = inlined_call_operand.vmem [shape: f32[1,128], index: 3, kind: input, shape index: {}]   ;;  %s1923_s4 = inlined_call_operand.vmem [shape: f32[1,128], index: 4, kind: input, shape index: {}]   ;;  %s1924_s5 = inlined_call_operand.vmem [shape: f32[1,128], index: 5, kind: input, shape index: {}]   ;;  %s1925_s6 = inlined_call_operand.vmem [shape: f32[1,128], index: 6, kind: input, shape index: {}]   ;;  %s1926_s7 = inlined_call_operand.hbm [shape: f32[2,48,128], index: 7, kind: output, shape index: {}]  }
   0x1   :  { %13 = vsyncpa [#allocation6], 0 }
   0x2   :  { %14 = vsyncpa [#allocation4], 0 }
   0x3   :  { %16 = vsyncpa [#allocation4 + $0x1], 0  ;;  %s1627_s24 = smov 0   ;;  %s1629_s25 = smov 0  }
   0x4   :  { %s1631_s26 = smov 0   ;;  %s1633_s27 = smov 0  }
   0x5   :  { %s1635_s28 = smov 0   ;;  %s1637_s29 = smov 0  }
   0x6   :  { %s1639_s30 = smov 0   ;;  %s1641_s8 = smov 0  }
   0x7 LB: > { %1937 = sst [smem:[#allocation11_spill]] %s1555_s26  ;;  %s977_s9 = sadd.s32 4294967295, %s1575_s8   ;;  %s1575_s8 = sphi %s1641_s8, %s22_s8   ;;  %s1571_s30 = sphi %s1639_s30, %s1963_s30   ;;  %s1567_s29 = sphi %s1637_s29, %s1962_s29   ;;  %s1563_s28 = sphi %s1635_s28, %s1961_s28   ;;  %s1559_s27 = sphi %s1633_s27, %s1960_s27   ;;  %s1555_s26 = sphi %s1631_s26, %s1959_s26   ;;  %s1551_s25 = sphi %s1629_s25, %s1965_s25   ;;  %s1547_s24 = sphi %s1627_s24, %s1964_s24  }
   0x8   : > { %1938 = sst [smem:[#allocation12_spill]] %s1567_s29  ;;  %s978_s10 = sadd.s32 4294967294, %s1575_s8  }
   0x9   : > { %1939 = sst [smem:[#allocation13_spill]] %s1571_s30  ;;  %s31_s11 = sadd.s32 1, %s1567_s29 }
   0xa   : > { %s34_s12 = sadd.s32 1, %s1571_s30  ;;  %p32_p0 = scmp.ge.s32.totalorder %s31_s11, 3 }
   0xb   : > { %s197_s13 = sadd.s32 1, %s1555_s26  ;;  %p207_p1 = scmp.ne.s32.totalorder %s1555_s26, %s1551_s25 }
   0xc   : > { %p208_p2 = scmp.eq.s32.totalorder %s977_s9, 5  ;;  %s1967_s11 = smov (%p32_p0, %s31_s11), 0 }
   0xd   : > { %1940 = sst [smem:[#allocation14_spill]] %s1967_s11  ;;  %s1969_s12 = smov (!%p32_p0, %s34_s12), %s1571_s30 }
   0xe   : > { %s193_s14 = ssub.s32 %s1567_s29, %s1967_s11  ;;  %p1679_p3 = por %p208_p2, %p207_p1 }
   0xf   : > { %p36_p4 = scmp.ge.s32.totalorder %s1969_s12, 2  ;;  %p213_p5 = scmp.ne.s32.totalorder %s1551_s25, %s1547_s24 }
  0x10   : > { %s1941_s15 = scalar_select %p1679_p3, 1, 0 }
  0x11   : > { %p214_p6 = scmp.eq.s32.totalorder %s978_s10, 5  ;;  %p979_p7 = scmp.ge.s32.totalorder %s1575_s8, 1 }
  0x12   : > { %s1971_s12 = smov (%p36_p4, %s1969_s12), 0  ;;  %p221_p9 = scmp.lt.s32.totalorder %s1575_s8, 7 }
  0x13   : > { %1942 = sst [smem:[#allocation15_spill]] %s1971_s12  ;;  %p1688_p8 = por %p214_p6, %p213_p5 }
  0x14   : > { %s192_s17 = ssub.s32 %s1571_s30, %s1971_s12  ;;  %p1695_p10 = pnand %p979_p7, %p221_p9 }
  0x15   : > { %s1943_s16 = scalar_select %p1688_p8, 1, 0 }
  0x16   : > { %s194_s18 = sor.u32 %s193_s14, %s192_s17  ;;  %p1699_p12 = scmp.eq.s32.totalorder %s977_s9, 0 }
  0x17   : > { %1944 = sst [smem:[#allocation16_spill]] %s1943_s16  ;;  %p195_p11 = scmp.eq.s32.totalorder %s194_s18, 0 }
  0x18   : > { %s1945_s19 = scalar_select %p1695_p10, 1, 0 }
  0x19   : > { %s1946_s20 = scalar_select %p1699_p12, 1, 0 }
  0x1a   : > { %p1328_p13 = pneg %p1695_p10  ;;  %s1577_s22 = smov [#allocation2]  }
  0x1b   : > { %s1706_s21 = scalar_select %p195_p11, %s1555_s26, %s197_s13  }
  0x1c   : > { %s233_s23 = sshll.u32 %s1577_s22, 4  ;;  %p1710_p0 = pnand %p1699_p12, %p1328_p13  ;;  %s234_s23 = int_to_ptr.vmem [resolvable:$true] %s233_s23 }
  0x1d   : > { %1947 = sst [smem:[#allocation17_spill]] %s1706_s21  ;;  %s1417_s17 = scalar_lea.hbm %s1920_s1, 6144 }
  0x1e   : > { %p1418_p1 = scmp.ne.s32.totalorder %s1920_s1, %s1417_s17  ;;  %p1419_p2 = pneg %p1710_p0 }
  0x1f   : > { %p1424_p6 = scmp.lt.u32.totalorder %s1417_s17, %s1920_s1 }
  0x20   : > { %p1420_p4 = pnand %p1419_p2, %p1418_p1 }
  0x22   : > { %p1421_p5 = pneg %p1420_p4 }
  0x24   : > { %p1426_p7 = pnand %p1424_p6, %p1421_p5 }
  0x26   : > { %1429 = shalt.err (!%p1426_p7)
}
  0x27   : > { %s1430_s11 = scalar_lea.vmem %s234_s23, 6144  ;;  %p1438_p8 = scmp.lt.s32.totalorder %s234_s23, %s234_s23 }
  0x28   : > { %p1431_p9 = scmp.ne.s32.totalorder %s234_s23, %s1430_s11  ;;  %p1439_p3 = scmp.lt.s32.totalorder %s1430_s11, %s1430_s11 }
  0x2a   : > { %p1433_p11 = pnand %p1431_p9, %p1419_p2  ;;  %p1440_p12 = por %p1439_p3, %p1438_p8 }
  0x2c   : > { %p1434_p13 = pneg %p1433_p11 }
  0x2e   : > { %p1441_p10 = pnand %p1440_p12, %p1434_p13 }
  0x30   : > { %1444 = shalt.err (!%p1441_p10)
}
  0x31   : > { %s1578_s12 = smov 128   ;;  %s1579_s14 = smov 8  }
  0x32   : > { %1331 = dma.hbm_to_vmem [thread:$0]  (!%p1710_p0), %s1920_s1, 6144, %s234_s23, [#allocation3], %s1578_s12, %s1578_s12, %s1579_s14  }
  0x33   : > { %s1580_s18 = smov [#allocation5]   ;;  %s1445_s29 = scalar_lea.hbm %s1921_s2, 6144 }
  0x34   : > { %s246_s13 = sshll.u32 %s1580_s18, 4  ;;  %p1446_p3 = scmp.ne.s32.totalorder %s1921_s2, %s1445_s29  ;;  %s247_s13 = int_to_ptr.vmem [resolvable:$true] %s246_s13 }
  0x35   : > { %p1452_p12 = scmp.lt.u32.totalorder %s1445_s29, %s1921_s2 }
  0x36   : > { %p1448_p8 = pnand %p1446_p3, %p1419_p2 }
  0x38   : > { %p1449_p10 = pneg %p1448_p8 }
  0x3a   : > { %p1454_p1 = pnand %p1452_p12, %p1449_p10 }
  0x3c   : > { %1457 = shalt.err (!%p1454_p1)
}
  0x3d   : > { %s1458_s23 = scalar_lea.vmem %s247_s13, 6144  ;;  %p1466_p7 = scmp.lt.s32.totalorder %s247_s13, %s247_s13 }
  0x3e   : > { %p1459_p4 = scmp.ne.s32.totalorder %s247_s13, %s1458_s23  ;;  %p1467_p9 = scmp.lt.s32.totalorder %s1458_s23, %s1458_s23 }
  0x40   : > { %p1461_p5 = pnand %p1459_p4, %p1419_p2  ;;  %p1468_p11 = por %p1467_p9, %p1466_p7 }
  0x42   : > { %p1462_p6 = pneg %p1461_p5 }
  0x44   : > { %p1469_p13 = pnand %p1468_p11, %p1462_p6 }
  0x46   : > { %1472 = shalt.err (!%p1469_p13)
}
  0x47   : > { %1334 = dma.hbm_to_vmem [thread:$0]  (!%p1710_p0), %s1921_s2, 6144, %s247_s13, [#allocation6], %s1578_s12, %s1578_s12, %s1579_s14  }
  0x48   : > { %p1949_p3 = scmp.ne.s32.totalorder %s1945_s19, 0 }
  0x49   : > { %p1950_p8 = scmp.ne.s32.totalorder (!%p1949_p3), %s1946_s20, 0 }
  0x4a   : > { %286 = sbr.rel (%p1949_p3) target bundleno = 596 (0x254), region = 48 }
  0x51   : > { %1534 = dma.done.wait (%p1950_p8), [#allocation3], 6144  }
  0x52   : > { %1536 = vsyncadd (%p1950_p8), [#allocation3], 4294961152 }
  0x53   : > { %1538 = dma.done.wait (%p1950_p8), [#allocation6], 6144  }
  0x54   : > { %1540 = vsyncadd (%p1950_p8), [#allocation6], 4294961152  ;;  %p326_p0 = scmp.lt.s32.totalorder %s1563_s28, 1  ;;  %v1581_v0 = vmov 0.0|0.0   ;;  %p328_p2 = scmp.lt.s32.totalorder %s1559_s27, 2  ;;  %vm1582_vm0 = vmmov 0  }
  0x55   : > { %1227 = vmatprep.subr.bf16.mxu1 %v1581_v0  ;;  %v1583_v1 = vmov 0.0   ;;  %v376_v2 = vld [vmem:[#allocation2 + $0x80] sm:$0xff]  ;;  %v377_v3 = vld [vmem:[#allocation2 + $0x88] sm:$0xff]  ;;  %v378_v11 = vld [vmem:[#allocation2 + $0x90] sm:$0xff]  ;;  %vm342_vm1 = vcmask 1046528   ;;  %vm351_vm2 = vcmask 1045504  }
  0x56   : > { %1151 = vmatprep.mubr.msk.f32.mxu1 %vm1582_vm0, %v1583_v1  ;;  %s1772_s26 = scalar_select %p326_p0, %s1563_s28, 1  ;;  %v360_v4 = vld [vmem:[#allocation2] sm:$0xff]  ;;  %v1195_v5 = vpack.c.bf16 %v377_v3, %v376_v2  ;;  %v361_v6 = vld [vmem:[#allocation2 + $0x8] sm:$0xff]  ;;  %v379_v12 = vld [vmem:[#allocation2 + $0x98] sm:$0xff] }
  0x57   : > { %s1775_s29 = scalar_select %p328_p2, %s1559_s27, 2  ;;  %v392_v7 = vld [vmem:[#allocation2 + $0x100] sm:$0xff]  ;;  %v393_v8 = vld [vmem:[#allocation2 + $0x108] sm:$0xff]  ;;  %v1197_v9 = vpack.c.bf16 %v361_v6, %v360_v4  ;;  %v362_v13 = vld [vmem:[#allocation2 + $0x10] sm:$0xff]  ;;  %v1199_v14 = vpack.c.bf16 %v379_v12, %v378_v11 }
  0x58   : > { %s1316_s16 = smul.u32 9, %s1772_s26  ;;  %v1228_v10 = vpack.c.bf16 %v393_v8, %v392_v7  ;;  %1196 = vmatprep.subr.bf16.mxu0 %v1195_v5  ;;  %v363_v15 = vld [vmem:[#allocation2 + $0x18] sm:$0xff]  ;;  %v394_v16 = vld [vmem:[#allocation2 + $0x110] sm:$0xff]  ;;  %v380_v20 = vld [vmem:[#allocation2 + $0xa0] sm:$0xff]  ;;  %s990_s17 = sshll.u32 %s1559_s27, 4 }
  0x59   : > { %s1315_s19 = smul.u32 3, %s1775_s29  ;;  %v395_v17 = vld [vmem:[#allocation2 + $0x118] sm:$0xff]  ;;  %1198 = vmatpush3.bf16.msra.mxu0 %v1197_v9  ;;  %v1201_v18 = vpack.c.bf16 %v363_v15, %v362_v13  ;;  %v381_v21 = vld [vmem:[#allocation2 + $0xa8] sm:$0xff]  ;;  %v364_v22 = vld [vmem:[#allocation2 + $0x20] sm:$0xff]  ;;  %s323_s21 = sand.u32 1, %s1551_s25  }
  0x5a   : > { %1229 = vmatpush3.bf16.msra.mxu1 %v1228_v10  ;;  %v1231_v19 = vpack.c.bf16 %v395_v17, %v394_v16  ;;  %1200 = vmatprep.subr.bf16.mxu0 %v1199_v14  ;;  %v1203_v23 = vpack.c.bf16 %v381_v21, %v380_v20  ;;  %v365_v24 = vld [vmem:[#allocation2 + $0x28] sm:$0xff]  ;;  %v396_v25 = vld [vmem:[#allocation2 + $0x120] sm:$0xff]  ;;  %v382_v27 = vld [vmem:[#allocation2 + $0xb0] sm:$0xff]  ;;  %s1317_s26 = smul.u32 6, %s1563_s28  ;;  %s1867_s18 = scalar_lea.sflag [#allocation4], %s323_s21 }
  0x5b   : > { %1230 = vmatprep.subr.bf16.mxu1 %v1581_v0  ;;  %v397_v26 = vld [vmem:[#allocation2 + $0x128] sm:$0xff]  ;;  %v383_v28 = vld [vmem:[#allocation2 + $0xb8] sm:$0xff]  ;;  %s332_s20 = sadd.s32 %s1316_s16, %s1315_s19  ;;  %v1205_v29 = vpack.c.bf16 %v365_v24, %v364_v22  ;;  %v366_v31 = vld [vmem:[#allocation2 + $0x30] sm:$0xff]  ;;  %s999_s19 = sshll.u32 %s1559_s27, 1 }
  0x5c   : > { %v1234_v30 = vpack.c.bf16 %v397_v26, %v396_v25  ;;  %v1207_v32 = vpack.c.bf16 %v383_v28, %v382_v27  ;;  %v367_v33 = vld [vmem:[#allocation2 + $0x38] sm:$0xff]  ;;  %v398_v34 = vld [vmem:[#allocation2 + $0x130] sm:$0xff]  ;;  %s987_s10 = sshll.u32 %s332_s20, 3  ;;  %v384_v36 = vld [vmem:[#allocation2 + $0xc0] sm:$0xff]  ;;  %s986_s20 = sshll.u32 %s323_s21, 4 }
  0x5d   : > { %1202 = vmatpush3.bf16.msra.mxu0 %v1201_v18  ;;  %v399_v35 = vld [vmem:[#allocation2 + $0x138] sm:$0xff]  ;;  %v385_v37 = vld [vmem:[#allocation2 + $0xc8] sm:$0xff]  ;;  %v1209_v38 = vpack.c.bf16 %v367_v33, %v366_v31  ;;  %v368_v40 = vld [vmem:[#allocation2 + $0x40] sm:$0xff]  ;;  %s1784_s9 = scalar_lea.vmem %s1919_s0, %s987_s10  ;;  %s867_s10 = sadd.s32 %s1317_s26, %s999_s19 }
  0x5e   : > { %1232 = vmatpush3.bf16.msra.mxu1 %v1231_v19  ;;  %1204 = vmatprep.subr.bf16.mxu0 %v1203_v23  ;;  %v1237_v39 = vpack.c.bf16 %v399_v35, %v398_v34  ;;  %v1211_v41 = vpack.c.bf16 %v385_v37, %v384_v36  ;;  %v369_v42 = vld [vmem:[#allocation2 + $0x48] sm:$0xff]  ;;  %v400_v43 = vld [vmem:[#allocation2 + $0x140] sm:$0xff]  ;;  %v386_v45 = vld [vmem:[#allocation2 + $0xd0] sm:$0xff]  ;;  %s1000_s12 = sshll.u32 %s867_s10, 7  ;;  %s325_s14 = scalar_lea.vmem [#allocation7], %s986_s20 }
  0x5f   : > { %1233 = vmatprep.subr.bf16.mxu1 %v1581_v0  ;;  %v401_v44 = vld [vmem:[#allocation2 + $0x148] sm:$0xff]  ;;  %v387_v46 = vld [vmem:[#allocation2 + $0xd8] sm:$0xff]  ;;  %v1788_v47 = vld [vmem:[%s1784_s9] sm:$0xff]  ;;  %v1213_v49 = vpack.c.bf16 %v369_v42, %v368_v40  ;;  %s1863_s27 = scalar_lea.hbm %s1926_s7, %s1000_s12  ;;  %p1955_p12 = scmp.ne.s32.totalorder %s1941_s15, 0 }
  0x60   : > { %v1791_v48 = vld [vmem:[%s1784_s9 + $0x8] sm:$0xff]  ;;  %v1240_v50 = vpack.c.bf16 %v401_v44, %v400_v43  ;;  %v370_v51 = vld [vmem:[#allocation2 + $0x50] sm:$0xff]  ;;  %v343_v52 = vrot.slane %v1788_v47, 1  ;;  %v1215_v54 = vpack.c.bf16 %v387_v46, %v386_v45  ;;  %v371_v55 = vld [vmem:[#allocation2 + $0x58] sm:$0xff]  ;;  %v352_v22 = vrot.slane %v1788_v47, 2  ;;  %s1584_s22 = smov [#allocation7]  }
  0x61   : > { %1206 = vmatpush3.bf16.msra.mxu0 %v1205_v29  ;;  %v344_v53 = vrot.slane %v1791_v48, 1  ;;  %v402_v56 = vld [vmem:[#allocation2 + $0x150] sm:$0xff]  ;;  %v403_v57 = vld [vmem:[#allocation2 + $0x158] sm:$0xff]  ;;  %v388_v58 = vld [vmem:[#allocation2 + $0xe0] sm:$0xff]  ;;  %v1217_v61 = vpack.c.bf16 %v371_v55, %v370_v51  ;;  %v353_v23 = vrot.slane %v1791_v48, 2  ;;  %s1477_s11 = sshll.u32 %s1584_s22, 4  ;;  %s1478_s11 = int_to_ptr.vmem [resolvable:$false] %s1477_s11 }
  0x62   : > { %1235 = vmatpush3.bf16.msra.mxu1 %v1234_v30  ;;  %1208 = vmatprep.subr.bf16.mxu0 %v1207_v32  ;;  %v389_v59 = vld [vmem:[#allocation2 + $0xe8] sm:$0xff]  ;;  %v1243_v62 = vpack.c.bf16 %v403_v57, %v402_v56  ;;  %v372_v63 = vld [vmem:[#allocation2 + $0x60] sm:$0xff]  ;;  %v390_v6 = vld [vmem:[#allocation2 + $0xf0] sm:$0xff]  ;;  %s1479_s23 = scalar_lea.vmem %s1478_s11, 512 }
  0x63   : > { %1236 = vmatprep.subr.bf16.mxu1 %v1581_v0  ;;  %v345_v60 = vsel %vm342_vm1, %v343_v52, %v344_v53  ;;  %v1219_v2 = vpack.c.bf16 %v389_v59, %v388_v58  ;;  %v373_v3 = vld [vmem:[#allocation2 + $0x68] sm:$0xff]  ;;  %v404_v4 = vld [vmem:[#allocation2 + $0x160] sm:$0xff]  ;;  %v391_v7 = vld [vmem:[#allocation2 + $0xf8] sm:$0xff]  ;;  %v1806_v33 = vsel %vm351_vm2, %v352_v22, %v353_v23 }
  0x64   : > { %472 = vmatprep.mubr.f32.mxu0 %v345_v60  ;;  %v405_v5 = vld [vmem:[#allocation2 + $0x168] sm:$0xff]  ;;  %v1221_v8 = vpack.c.bf16 %v373_v3, %v372_v63  ;;  %v374_v10 = vld [vmem:[#allocation2 + $0x70] sm:$0xff]  ;;  %v375_v11 = vld [vmem:[#allocation2 + $0x78] sm:$0xff]  ;;  %v1223_v13 = vpack.c.bf16 %v391_v7, %v390_v6 }
  0x65   : > { %1210 = vmatpush3.bf16.msra.mxu0 %v1209_v38  ;;  %v1246_v9 = vpack.c.bf16 %v405_v5, %v404_v4  ;;  %v406_v12 = vld [vmem:[#allocation2 + $0x170] sm:$0xff]  ;;  %v407_v14 = vld [vmem:[#allocation2 + $0x178] sm:$0xff]  ;;  %v648_v16 = vld [vmem:[#allocation5 + $0x80] sm:$0xff]  ;;  %v1225_v20 = vpack.c.bf16 %v375_v11, %v374_v10 }
  0x66   : > { %1238 = vmatpush3.bf16.msra.mxu1 %v1237_v39  ;;  %1212 = vmatprep.subr.bf16.mxu0 %v1211_v41  ;;  %v338_v15 = vld [vmem:[%s1784_s9 + $0x10] sm:$0xf]  ;;  %v649_v17 = vld [vmem:[#allocation5 + $0x88] sm:$0xff]  ;;  %v664_v18 = vld [vmem:[#allocation5 + $0x100] sm:$0xff]  ;;  %v1249_v21 = vpack.c.bf16 %v407_v14, %v406_v12  ;;  %s870_s9 = sshll.u32 %s325_s14, 4  ;;  %s1865_s9 = int_to_ptr.vmem [resolvable:$true] %s870_s9 }
  0x67   : > { %1239 = vmatprep.subr.bf16.mxu1 %v1581_v0  ;;  %v665_v19 = vld [vmem:[#allocation5 + $0x108] sm:$0xff]  ;;  %v346_v24 = vrot.slane %v338_v15, 1  ;;  %v1251_v25 = vpack.c.bf16 %v649_v17, %v648_v16  ;;  %v632_v27 = vld [vmem:[#allocation5] sm:$0xff]  ;;  %v650_v29 = vld [vmem:[#allocation5 + $0x90] sm:$0xff]  ;;  %v355_v34 = vrot.slane %v338_v15, 2  ;;  %s1473_s13 = scalar_lea.vmem %s1865_s9, 256  ;;  %p1480_p5 = scmp.lt.s32.totalorder %s1865_s9, %s1478_s11 }
  0x68   : > { %v1283_v26 = vpack.c.bf16 %v665_v19, %v664_v18  ;;  %v633_v28 = vld [vmem:[#allocation5 + $0x8] sm:$0xff]  ;;  %v651_v30 = vld [vmem:[#allocation5 + $0x98] sm:$0xff]  ;;  %v666_v31 = vld [vmem:[#allocation5 + $0x110] sm:$0xff]  ;;  %p1474_p10 = scmp.ne.s32.totalorder %s1865_s9, %s1473_s13  ;;  %p1481_p6 = scmp.lt.s32.totalorder %s1479_s23, %s1473_s13 }
  0x69   : > { %1214 = vmatpush3.bf16.msra.mxu0 %v1213_v49  ;;  %v667_v32 = vld [vmem:[#allocation5 + $0x118] sm:$0xff]  ;;  %v1253_v35 = vpack.c.bf16 %v633_v28, %v632_v27  ;;  %v1255_v36 = vpack.c.bf16 %v651_v30, %v650_v29  ;;  %v634_v37 = vld [vmem:[#allocation5 + $0x10] sm:$0xff]  ;;  %v652_v40 = vld [vmem:[#allocation5 + $0xa0] sm:$0xff]  ;;  %v1816_v42 = vsel %vm351_vm2, %v353_v23, %v355_v34 }
  0x6a   : > { %1241 = vmatpush3.bf16.msra.mxu1 %v1240_v50  ;;  %1216 = vmatprep.subr.bf16.mxu0 %v1215_v54  ;;  %v635_v38 = vld [vmem:[#allocation5 + $0x18] sm:$0xff]  ;;  %v1287_v39 = vpack.c.bf16 %v667_v32, %v666_v31  ;;  %v653_v41 = vld [vmem:[#allocation5 + $0xa8] sm:$0xff]  ;;  %v636_v45 = vld [vmem:[#allocation5 + $0x20] sm:$0xff]  ;;  %p1475_p1 = pnand %p1474_p10, %p1955_p12  ;;  %p1482_p7 = por %p1481_p6, %p1480_p5 }
  0x6b   : > { %1242 = vmatprep.subr.bf16.mxu1 %v1581_v0  ;;  %v1257_v43 = vpack.c.bf16 %v635_v38, %v634_v37  ;;  %v1259_v44 = vpack.c.bf16 %v653_v41, %v652_v40  ;;  %v637_v46 = vld [vmem:[#allocation5 + $0x28] sm:$0xff]  ;;  %v668_v49 = vld [vmem:[#allocation5 + $0x120] sm:$0xff]  ;;  %v654_v52 = vld [vmem:[#allocation5 + $0xb0] sm:$0xff] }
  0x6c   : > { %v669_v50 = vld [vmem:[#allocation5 + $0x128] sm:$0xff]  ;;  %v639_v55 = vld [vmem:[#allocation5 + $0x38] sm:$0xff]  ;;  %v656_v59 = vld [vmem:[#allocation5 + $0xc0] sm:$0xff]  ;;  %p1476_p4 = pneg %p1475_p1 }
  0x6d   : > { %1218 = vmatpush3.bf16.msra.mxu0 %v1217_v61  ;;  %v1291_v51 = vpack.c.bf16 %v669_v50, %v668_v49  ;;  %v671_v57 = vld [vmem:[#allocation5 + $0x138] sm:$0xff]  ;;  %v657_v60 = vld [vmem:[#allocation5 + $0xc8] sm:$0xff]  ;;  %v672_v3 = vld [vmem:[#allocation5 + $0x140] sm:$0xff] }
  0x6e   : > { %1244 = vmatpush3.bf16.msra.mxu1 %v1243_v62  ;;  %1220 = vmatprep.subr.bf16.mxu0 %v1219_v2  ;;  %v1267_v61 = vpack.c.bf16 %v657_v60, %v656_v59  ;;  %v640_v62 = vld [vmem:[#allocation5 + $0x40] sm:$0xff]  ;;  %v641_v63 = vld [vmem:[#allocation5 + $0x48] sm:$0xff]  ;;  %v658_v6 = vld [vmem:[#allocation5 + $0xd0] sm:$0xff]  ;;  %p1483_p9 = pnand %p1482_p7, %p1476_p4 }
  0x6f   : > { %1245 = vmatprep.subr.bf16.mxu1 %v1581_v0  ;;  %v1269_v2 = vpack.c.bf16 %v641_v63, %v640_v62  ;;  %v673_v4 = vld [vmem:[#allocation5 + $0x148] sm:$0xff]  ;;  %v659_v7 = vld [vmem:[#allocation5 + $0xd8] sm:$0xff]  ;;  %v674_v12 = vld [vmem:[#allocation5 + $0x150] sm:$0xff] }
  0x70   : > { %v1299_v5 = vpack.c.bf16 %v673_v4, %v672_v3  ;;  %v643_v10 = vld [vmem:[#allocation5 + $0x58] sm:$0xff]  ;;  %v661_v16 = vld [vmem:[#allocation5 + $0xe8] sm:$0xff]  ;;  %v644_v18 = vld [vmem:[#allocation5 + $0x60] sm:$0xff] }
  0x71   : > { %1222 = vmatpush3.bf16.msra.mxu0 %v1221_v8  ;;  %v1271_v8 = vpack.c.bf16 %v659_v7, %v658_v6  ;;  %v645_v19 = vld [vmem:[#allocation5 + $0x68] sm:$0xff]  ;;  %v646_v27 = vld [vmem:[#allocation5 + $0x70] sm:$0xff]  ;;  %v647_v28 = vld [vmem:[#allocation5 + $0x78] sm:$0xff] }
  0x72   : > { %1247 = vmatpush3.bf16.msra.mxu1 %v1246_v9  ;;  %1224 = vmatprep.subr.bf16.mxu0 %v1223_v13  ;;  %v642_v9 = vld [vmem:[#allocation5 + $0x50] sm:$0xff]  ;;  %v675_v13 = vld [vmem:[#allocation5 + $0x158] sm:$0xff]  ;;  %v677_v22 = vld [vmem:[#allocation5 + $0x168] sm:$0xff]  ;;  %v1281_v29 = vpack.c.bf16 %v647_v28, %v646_v27 }
  0x73   : > { %1248 = vmatprep.subr.bf16.mxu1 %v1581_v0  ;;  %v347_v0 = vsel %vm342_vm1, %v344_v53, %v346_v24  ;;  %v655_v53 = vld [vmem:[#allocation5 + $0xb8] sm:$0xff]  ;;  %v1273_v11 = vpack.c.bf16 %v643_v10, %v642_v9  ;;  %v1303_v14 = vpack.c.bf16 %v675_v13, %v674_v12  ;;  %v678_v30 = vld [vmem:[#allocation5 + $0x170] sm:$0xff] }
  0x74   : > { %v1263_v54 = vpack.c.bf16 %v655_v53, %v654_v52  ;;  %v679_v31 = vld [vmem:[#allocation5 + $0x178] sm:$0xff]  ;;  %v989_v52 = vld [vmem:[%s1923_s4] ss:$0 sm:$0xff] }
  0x75   : > { %1226 = vmatpush3.bf16.msra.mxu0 %v1225_v20  ;;  %v1277_v20 = vpack.c.bf16 %v645_v19, %v644_v18  ;;  %v1311_v32 = vpack.c.bf16 %v679_v31, %v678_v30 }
  0x76   : > { %1250 = vmatpush3.bf16.msra.mxu1 %v1249_v21  ;;  %1252 = vmatprep.subr.bf16.mxu0 %v1251_v25  ;;  %v676_v21 = vld [vmem:[#allocation5 + $0x160] sm:$0xff]  ;;  %v663_v25 = vld [vmem:[#allocation5 + $0xf8] sm:$0xff] }
  0x77   : > { %1284 = vmatprep.subr.bf16.mxu1 %v1283_v26  ;;  %v1307_v23 = vpack.c.bf16 %v677_v22, %v676_v21 }
  0x78   : > { %473 = vmatmul.mubr.f32.vlgmr.msra.gmra.mrb[0].mxu0 %v1788_v47  ;;  %v1261_v47 = vpack.c.bf16 %v637_v46, %v636_v45  ;;  %v988_v46 = vld [vmem:[%s1922_s3] ss:$0 sm:$0xff] }
  0x79   : > { %1152 = vmatmul.mubr.f32.vlgmr.msra.gmra.mrb[0].mxu1 %v1806_v33  ;;  %477 = vmatprep.mubr.f32.mxu0 %v347_v0 }
  0x7a   : > { %1154 = vmatprep.mubr.msk.f32.mxu1 %vm1582_vm0, %v1583_v1  ;;  %1254 = vmatpush3.bf16.msra.mxu0 %v1253_v35  ;;  %v596_v35 = vstv %s990_s17 }
  0x7b   : > { %1286 = vmatpush3.bf16.msra.mxu1 %v1283_v26  ;;  %1256 = vmatprep.subr.bf16.mxu0 %v1255_v36 }
  0x7c   : > { %1288 = vmatprep.subr.bf16.mxu1 %v1287_v39  ;;  %478 = vmatmul.mubr.f32.gmra.mrb[2].mxu0 %v1791_v48  ;;  %v638_v48 = vld [vmem:[#allocation5 + $0x30] sm:$0xff] }
  0x7d   : > { %1155 = vmatmul.mubr.f32.gmra.mrb[2].mxu1 %v1816_v42  ;;  %482 = vmatprep.mubr.f32.mxu0 %v346_v24  ;;  %v1265_v56 = vpack.c.bf16 %v639_v55, %v638_v48  ;;  %v662_v24 = vld [vmem:[#allocation5 + $0xf0] sm:$0xff] }
  0x7e   : > { %1157 = vmatprep.mubr.msk.f32.mxu1 %vm1582_vm0, %v1583_v1  ;;  %1258 = vmatpush3.bf16.msra.mxu0 %v1257_v43  ;;  %v670_v1 = vld [vmem:[#allocation5 + $0x130] sm:$0xff]  ;;  %v1279_v26 = vpack.c.bf16 %v663_v25, %v662_v24 }
  0x7f   : > { %1290 = vmatpush3.bf16.msra.mxu1 %v1287_v39  ;;  %1260 = vmatprep.subr.bf16.mxu0 %v1259_v44  ;;  %v1295_v58 = vpack.c.bf16 %v671_v57, %v670_v1 }
  0x80   : > { %483 = vmatmul.mubr.f32.gmra.mrb[4].mxu0 %v338_v15  ;;  %1292 = vmatprep.subr.bf16.mxu1 %v1291_v51  ;;  %v660_v15 = vld [vmem:[#allocation5 + $0xe0] sm:$0xff] }
  0x81   : > { %1158 = vmatmul.mubr.f32.gmra.mrb[4].mxu1 %v355_v34  ;;  %v1275_v17 = vpack.c.bf16 %v661_v16, %v660_v15  ;;  %v592_v34 = vlaneseq }
  0x82   : > { %1262 = vmatpush3.bf16.msra.mxu0 %v1261_v47 }
  0x83   : > { %1264 = vmatprep.subr.bf16.mxu0 %v1263_v54  ;;  %1294 = vmatpush3.bf16.msra.mxu1 %v1291_v51  ;;  %v593_v0 = vshrl.u32 %v592_v34, 7 }
  0x84   : > { %1296 = vmatprep.subr.bf16.mxu1 %v1295_v58 }
  0x85   : > { %v594_v36 = vadd.s32 8, %v593_v0  ;;  %v597_v39 = vadd.s32 %v596_v35, %v593_v0  ;;  %v595_v44 = vadd.s32 16, %v593_v0 }
  0x86   : > { %1266 = vmatpush3.bf16.msra.mxu0 %v1265_v56 }
  0x87   : > { %1268 = vmatprep.subr.bf16.mxu0 %v1267_v61  ;;  %1298 = vmatpush3.bf16.msra.mxu1 %v1295_v58  ;;  %v598_v43 = vadd.s32 %v596_v35, %v594_v36  ;;  %v991_v49 = vadd.s32 4294967295, %v597_v39  ;;  %v599_v55 = vadd.s32 %v596_v35, %v595_v44  ;;  %v997_v35 = vld [vmem:[%s1925_s6] ss:$0 sm:$0xff] }
  0x88   : > { %1300 = vmatprep.subr.bf16.mxu1 %v1299_v5 }
  0x89   : > { %v992_v54 = vadd.s32 4294967295, %v598_v43  ;;  %vm603_vm3 = vcmp.ge.s32.totalorder %v991_v49, 0  ;;  %vm606_vm4 = vcmp.lt.s32.totalorder %v991_v49, 40  ;;  %v993_v62 = vadd.s32 4294967295, %v599_v55 }
  0x8a   : > { %1270 = vmatpush3.bf16.msra.mxu0 %v1269_v2  ;;  %vm1829_vm7 = vmand %vm603_vm3, %vm606_vm4 }
  0x8b   : > { %1272 = vmatprep.subr.bf16.mxu0 %v1271_v8  ;;  %1302 = vmatpush3.bf16.msra.mxu1 %v1299_v5  ;;  %vm604_vm5 = vcmp.ge.s32.totalorder %v992_v54, 0  ;;  %vm607_vm6 = vcmp.lt.s32.totalorder %v992_v54, 40  ;;  %vm605_vm9 = vcmp.ge.s32.totalorder %v993_v62, 0  ;;  %vm608_vm10 = vcmp.lt.s32.totalorder %v993_v62, 40 }
  0x8c   : > { %1304 = vmatprep.subr.bf16.mxu1 %v1303_v14  ;;  %vm1833_vm8 = vmand %vm604_vm5, %vm607_vm6 }
  0x8d   : > { %vm611_vm11 = vmand %vm605_vm9, %vm608_vm10 }
  0x8e   : > { %1274 = vmatpush3.bf16.msra.mxu0 %v1273_v11 }
  0x8f   : > { %1276 = vmatprep.subr.bf16.mxu0 %v1275_v17  ;;  %1306 = vmatpush3.bf16.msra.mxu1 %v1303_v14 }
  0x90   : > { %1308 = vmatprep.subr.bf16.mxu1 %v1307_v23 }
  0x92   : > { %1278 = vmatpush3.bf16.msra.mxu0 %v1277_v20 }
  0x93   : > { %1280 = vmatprep.subr.bf16.mxu0 %v1279_v26  ;;  %1310 = vmatpush3.bf16.msra.mxu1 %v1307_v23 }
  0x94   : > { %1312 = vmatprep.subr.bf16.mxu1 %v1311_v32 }
  0x96   : > { %1282 = vmatpush3.bf16.msra.mxu0 %v1281_v29 }
  0x97   : > { %1314 = vmatpush3.bf16.msra.mxu1 %v1311_v32  ;;  %v996_v32 = vld [vmem:[%s1924_s5] ss:$0 sm:$0xff] }
 0x14b   : > { %v1035_v37 = vpop.f32.mrb[0].mxu0 }
 0x14c   : > { %v554_v38 = vpop.f32.mrb[0].mxu1  ;;  %v1036_v40 = vpop.f32.mrb[1].mxu0 }
 0x14d   : > { %v1153_v41 = vpop.f32.mrb[1].mxu1  ;;  %v1037_v45 = vadd.f32 %v1036_v40, %v1035_v37 }
 0x14f   : > { %v555_v47 = vadd.f32 %v1037_v45, %v554_v38  ;;  %v1038_v50 = vpop.f32.mrb[2].mxu0 }
 0x150   : > { %v559_v51 = vpop.f32.mrb[2].mxu1  ;;  %v1039_v53 = vpop.f32.mrb[3].mxu0 }
 0x151   : > { %v1156_v48 = vpop.f32.mrb[3].mxu1  ;;  %v575_v56 = vmul.f32 %v988_v46, %v555_v47  ;;  %v1040_v1 = vadd.f32 %v1039_v53, %v1038_v50 }
 0x153   : > { %v585_v57 = vadd.f32 %v989_v52, %v575_v56  ;;  %v560_v58 = vadd.f32 %v1040_v1, %v559_v51  ;;  %v1041_v59 = vpop.f32.mrb[4].mxu0 }
 0x154   : > { %v564_v60 = vpop.f32.mrb[4].mxu1  ;;  %v1042_v61 = vpop.f32.mrb[5].mxu0 }
 0x155   : > { %v1159_v63 = vpop.f32.mrb[5].mxu1  ;;  %v588_v2 = vmax.f32 %v585_v57, 0.0  ;;  %v576_v3 = vmul.f32 %v988_v46, %v560_v58  ;;  %v1043_v4 = vadd.f32 %v1042_v61, %v1041_v59 }
 0x157   : > { %v586_v6 = vadd.f32 %v989_v52, %v576_v3  ;;  %v565_v7 = vadd.f32 %v1043_v4, %v564_v60  ;;  %v612_v9 = vsel %vm1829_vm7, %v588_v2, 0.0 }
 0x158   : > { %v618_v14 = vrot.slane %v612_v9, 1  ;;  %v625_v16 = vrot.slane %v612_v9, 2 }
 0x159   : > { %v589_v10 = vmax.f32 %v586_v6, 0.0  ;;  %v577_v11 = vmul.f32 %v988_v46, %v565_v7 }
 0x15b   : > { %v613_v12 = vsel %vm1833_vm8, %v589_v10, 0.0  ;;  %v587_v13 = vadd.f32 %v989_v52, %v577_v11 }
 0x15c   : > { %v619_v15 = vrot.slane %v613_v12, 1  ;;  %v626_v17 = vrot.slane %v613_v12, 2 }
 0x15d   : > { %v590_v18 = vmax.f32 %v587_v13, 0.0 }
 0x15e   : > { %v620_v19 = vsel %vm342_vm1, %v618_v14, %v619_v15  ;;  %v627_v20 = vsel %vm351_vm2, %v625_v16, %v626_v17 }
 0x15f   : > { %v614_v21 = vsel %vm611_vm11, %v590_v18, 0.0  ;;  %744 = vmatprep.mubr.f32.mxu0 %v620_v19  ;;  %1192 = vmatprep.mubr.f32.mxu1 %v627_v20 }
 0x160   : > { %v628_v22 = vrot.slane %v614_v21, 2  ;;  %994 = vmatmul.mubr.msk.f32.vlgmr.msra.gmra.mrb[6].mxu0 %vm1829_vm7, %v588_v2  ;;  %v621_v23 = vrot.slane %v614_v21, 1 }
 0x162   : > { %v622_v24 = vsel %vm342_vm1, %v619_v15, %v621_v23  ;;  %v629_v25 = vsel %vm351_vm2, %v626_v17, %v628_v22 }
 0x163   : > { %749 = vmatprep.mubr.f32.mxu0 %v622_v24  ;;  %1193 = vmatmul.mubr.f32.vlgmr.msra.gmra.mrb[6].mxu1 %v629_v25 }
 0x164   : > { %995 = vmatmul.mubr.msk.f32.gmra.mrb[8].mxu0 %vm1833_vm8, %v589_v10 }
 0x233   : > { %v1095_v26 = vpop.f32.mrb[6].mxu0 }
 0x234   : > { %v1096_v27 = vpop.f32.mrb[7].mxu0 }
 0x235   : > { %v1097_v28 = vadd.f32 %v1096_v27, %v1095_v26 }
 0x236   : > { %v1194_v29 = vpop.f32.mrb[6].mxu1 }
 0x237   : > { %v1098_v30 = vpop.f32.mrb[8].mxu0  ;;  %v821_v31 = vpop.f32.mrb[7].mxu1 }
 0x238   : > { %v822_v34 = vadd.f32 %v1097_v28, %v821_v31  ;;  %v1099_v0 = vpop.f32.mrb[9].mxu0 }
 0x239   : > { %v1100_v36 = vadd.f32 %v1099_v0, %v1098_v30 }
 0x23a   : > { %v837_v37 = vmul.f32 %v996_v32, %v822_v34 }
 0x23b   : > { %v827_v38 = vadd.f32 %v1194_v29, %v1100_v36 }
 0x23c   : > { %v846_v39 = vadd.f32 %v997_v35, %v837_v37 }
 0x23d   : > { %v838_v40 = vmul.f32 %v996_v32, %v827_v38 }
 0x23e   : > { %v848_v41 = vadd.f32 %v846_v39, %v1806_v33 }
 0x23f   : > { %v847_v43 = vadd.f32 %v997_v35, %v838_v40 }
 0x240   : > { %v850_v44 = vmax.f32 %v848_v41, 0.0 }
 0x241   : > { %v849_v45 = vadd.f32 %v847_v43, %v1816_v42 }
 0x242   : > { %852 = vst [vmem:[%s325_s14] sm:$0xff] %v850_v44 }
 0x243   : > { %v851_v46 = vmax.f32 %v849_v45, 0.0 }
 0x245   : > { %853 = vst [vmem:[%s325_s14 + $0x8] sm:$0xff] %v851_v46 }
 0x246   : > { %1486 = shalt.err (!%p1483_p9)
}
 0x247   : > { %s1487_s30 = scalar_lea.hbm %s1863_s27, 256  ;;  %s1491_s29 = scalar_lea.hbm %s1926_s7, 1536 }
 0x248   : > { %p1488_p11 = scmp.ne.s32.totalorder %s1863_s27, %s1487_s30  ;;  %p1492_p8 = scmp.lt.u32.totalorder %s1863_s27, %s1926_s7 }
 0x249   : > { %p1493_p0 = scmp.lt.u32.totalorder %s1491_s29, %s1487_s30  ;;  %p1495_p10 = scmp.lt.u32.totalorder %s1487_s30, %s1863_s27 }
 0x24a   : > { %p1489_p13 = pnand %p1488_p11, %p1955_p12 }
 0x24b   : > { %p1494_p2 = por %p1493_p0, %p1492_p8 }
 0x24c   : > { %p1490_p3 = pneg %p1489_p13 }
 0x24d   : > { %p1496_p1 = por %p1495_p10, %p1494_p2 }
 0x24f   : > { %p1497_p4 = pnand %p1496_p1, %p1490_p3 }
 0x251   : > { %1500 = shalt.err (!%p1497_p4)
}
 0x252   : > { %s1585_s20 = smov 128   ;;  %s1586_s10 = smov 8  }
 0x253   : > { %1326 = dma.vmem_to_hbm [thread:$0]  (%p1955_p12), %s1865_s9, 256, %s1863_s27, %s1867_s18, %s1585_s20, %s1585_s20, %s1586_s10  }
 0x254 PF: > { %s1956_s12 = sld [smem:[#allocation16_spill]]  ;;  %p1343_p5 = scmp.ge.s32.totalorder %s1575_s8, 2 }
 0x255   : > { %s885_s14 = sand.u32 1, %s1547_s24  }
 0x256   : > { %s886_s28 = scalar_lea.sflag [#allocation4], %s885_s14 }
 0x25a   : > { %p1957_p6 = scmp.ne.s32.totalorder %s1956_s12, 0 }
 0x25c   : > { %p1336_p7 = pnand %p1343_p5, %p1957_p6 }
 0x25e   : > { %1542 = dma.done.wait (!%p1336_p7), %s886_s28, 256  }
 0x25f   : > { %1544 = vsyncadd (!%p1336_p7), %s886_s28, 4294967040  ;;  %s22_s8 = sadd.s32 1, %s1575_s8   ;;  %s1958_s17 = sld [smem:[#allocation11_spill]] }
 0x260   : > { %p19_p9 = scmp.ge.s32.totalorder %s22_s8, 8   ;;  %s1959_s26 = sld [smem:[#allocation17_spill]] }
 0x261   : > { %s1960_s27 = sld [smem:[#allocation12_spill]]  ;;  %s1961_s28 = sld [smem:[#allocation13_spill]] }
 0x262   : > { %s1962_s29 = sld [smem:[#allocation14_spill]]  ;;  %s1963_s30 = sld [smem:[#allocation15_spill]] }
 0x263   : > { %s1964_s24 = smov %s1551_s25  ;;  %21 = sbr.rel (!%p19_p9) target bundleno = 7 (0x7), region = 92 }
 0x265   : > { %s1965_s25 = smov %s1958_s17 }
 0x26a   :  { %891 = vsyncpa [#allocation3], 1 }
 0x26b   :  { %893 = vsyncpa [#allocation3 + $0x1], 1 }
 0x26c   :  { %894 = vsyncpa [#allocation6], 1 }
 0x26d   :  { %895 = vsyncpa [#allocation4], 1 }
 0x26e   :  { %897 = vsyncpa [#allocation4 + $0x1], 1 }

</bundles_post_ra>
